<compile_context>
chip_gen: v7x
topology: tpu7x:2x2x1
jax: 0.10.0
libtpu: 0.0.40
codegen_flags: <defaults>
</compile_context>

<pallas_src>
import functools

import jax
import jax.numpy as jnp
from jax.experimental import pallas as pl
from jax.experimental.pallas import tpu as pltpu

LANE = 128          # lane width
ROW_ALIGN = 16      # bf16 packs 16 rows per (sublane, lane) tile; also fine for f32
HIDDEN = 400        # logical hidden size (padded to 512 inside the kernel)
MAX_BATCH_TILE = 512


def _round_up(x, m):
    return ((x + m - 1) // m) * m


def _cdiv(a, b):
    return -(-a // b)


def mlp_kernel(x_ref, w1_ref, b1_ref, w2_ref, b2_ref, w3_ref, b3_ref, o_ref):
    """One batch tile of the fused MLP.

    All matmuls accumulate in f32 on the MXU; bias-add and ReLU run in f32 on the
    VPU (v5e has no bf16 VPU). Activations are cast back to the weight dtype only
    for the next MXU push.
    """
    # Layer 1: Linear + ReLU
    h1 = jnp.dot(x_ref[...], w1_ref[...], preferred_element_type=jnp.float32)
    h1 = jnp.maximum(h1 + b1_ref[...], 0.0)

    # Layer 2: Linear + ReLU
    h2 = jnp.dot(h1.astype(w2_ref.dtype), w2_ref[...],
                 preferred_element_type=jnp.float32)
    h2 = jnp.maximum(h2 + b2_ref[...], 0.0)

    # Layer 3: Linear (Q-values, no activation) -> lane-dense (padded) output
    q = jnp.dot(h2.astype(w3_ref.dtype), w3_ref[...],
                preferred_element_type=jnp.float32)
    o_ref[...] = (q + b3_ref[...]).astype(o_ref.dtype)


def pad_params(params, state_size, action_size, use_bf16=True):
    """Zero-pad params to aligned shapes (done ONCE, outside the hot path).

    Padded shapes:
      w1: (K_pad, H_pad)   b1: (1, H_pad)      K_pad = round_up(state_size, 16)
      w2: (H_pad, H_pad)   b2: (1, H_pad)      H_pad = 512
      w3: (H_pad, N_pad)   b3: (1, N_pad)      N_pad = round_up(action_size, 128)

    Zero fill keeps the math identical: padded x columns hit zero w1 rows, padded
    hidden lanes are relu(0 + 0) = 0, padded output lanes are sliced off.
    The returned dict contains ONLY jax arrays, so it passes cleanly through jit.
    """
    k_pad = _round_up(max(state_size, 1), ROW_ALIGN)
    h_pad = _round_up(HIDDEN, LANE)            # 400 -> 512
    n_pad = _round_up(max(action_size, 1), LANE)

    wdt = jnp.bfloat16 if use_bf16 else jnp.float32

    def pad2(a, r, c, dt):
        return jnp.pad(a, ((0, r - a.shape[0]), (0, c - a.shape[1]))).astype(dt)

    return {
        "w1": pad2(params["w1"], k_pad, h_pad, wdt),
        "b1": pad2(params["b1"], 1, h_pad, jnp.float32),
        "w2": pad2(params["w2"], h_pad, h_pad, wdt),
        "b2": pad2(params["b2"], 1, h_pad, jnp.float32),
        "w3": pad2(params["w3"], h_pad, n_pad, wdt),
        "b3": pad2(params["b3"], 1, n_pad, jnp.float32),
    }


@functools.partial(jax.jit, static_argnames=("action_size",))
def neural_network_forward(x, padded_params, action_size):
    """x: (B, state_size) float32. padded_params: output of pad_params()."""
    w1, b1 = padded_params["w1"], padded_params["b1"]
    w2, b2 = padded_params["w2"], padded_params["b2"]
    w3, b3 = padded_params["w3"], padded_params["b3"]
    k_pad, h_pad = w1.shape
    n_pad = w3.shape[1]
    wdt = w1.dtype

    B, K = x.shape

    # Batch tiling: pad B to a 16-row multiple, then pick the per-call tile so the
    # number of wasted (padded) rows is minimal and tb <= MAX_BATCH_TILE.
    b_rounded = _round_up(max(B, 1), ROW_ALIGN)
    n_tiles = _cdiv(b_rounded, MAX_BATCH_TILE)
    tb = _round_up(_cdiv(b_rounded, n_tiles), ROW_ALIGN)
    b_pad = n_tiles * tb

    # Zero-pad x to (b_pad, k_pad) and cast matmul inputs to the weight dtype.
    x_p = jnp.pad(x, ((0, b_pad - B), (0, k_pad - K))).astype(wdt)

    const = lambda shape: pl.BlockSpec(shape, lambda i: (0, 0))  # weights resident

    w_itemsize = jnp.dtype(wdt).itemsize
    flops = 2 * b_pad * (k_pad * h_pad + h_pad * h_pad + h_pad * n_pad)
    bytes_accessed = (
        x_p.size * w_itemsize
        + (w1.size + w2.size + w3.size) * w_itemsize
        + (b1.size + b2.size + b3.size) * 4
        + b_pad * n_pad * 4
    )
    cost = pl.CostEstimate(flops=flops, transcendentals=0,
                           bytes_accessed=bytes_accessed)

    out_p = pl.pallas_call(
        mlp_kernel,
        out_shape=jax.ShapeDtypeStruct((b_pad, n_pad), jnp.float32),
        grid=(n_tiles,),
        in_specs=[
            pl.BlockSpec((tb, k_pad), lambda i: (i, 0)),   # x: tiled over batch
            const((k_pad, h_pad)),                         # w1
            const((1, h_pad)),                             # b1
            const((h_pad, h_pad)),                         # w2
            const((1, h_pad)),                             # b2
            const((h_pad, n_pad)),                         # w3
            const((1, n_pad)),                             # b3
        ],
        out_specs=pl.BlockSpec((tb, n_pad), lambda i: (i, 0)),
        compiler_params=pltpu.CompilerParams(
            dimension_semantics=("parallel",),
        ),
        cost_estimate=cost,
    )(x_p, w1, b1, w2, b2, w3, b3)

    # Slice back to the logical shape (free layout plumbing outside the kernel).
    return out_p[:B, :action_size]


def init_params(key, state_size, action_size, hidden=HIDDEN):
    """Deterministic init matching nn.Linear default: U(-1/sqrt(fan_in), 1/sqrt(fan_in))."""
    ks = jax.random.split(key, 6)

    def lin(kw, kb, fan_in, fan_out):
        bound = 1.0 / jnp.sqrt(jnp.float32(fan_in))
        w = jax.random.uniform(kw, (fan_in, fan_out), jnp.float32, -bound, bound)
        b = jax.random.uniform(kb, (1, fan_out), jnp.float32, -bound, bound)
        return w, b

    w1, b1 = lin(ks[0], ks[1], state_size, hidden)
    w2, b2 = lin(ks[2], ks[3], hidden, hidden)
    w3, b3 = lin(ks[4], ks[5], hidden, action_size)
    return {"w1": w1, "b1": b1, "w2": w2, "b2": b2, "w3": w3, "b3": b3}


if __name__ == "__main__":
    key = jax.random.PRNGKey(0)
    k_params, k_x = jax.random.split(key)

    batch = 8
    state_size = 32
    action_size = 8

    params = init_params(k_params, state_size, action_size)
    x = jax.random.normal(k_x, (batch, state_size), jnp.float32)

    # Pure-JAX reference of the same forward pass (matches PyTorch semantics).
    def ref(x, p):
        h1 = jnp.maximum(x @ p["w1"] + p["b1"], 0.0)
        h2 = jnp.maximum(h1 @ p["w2"] + p["b2"], 0.0)
        return h2 @ p["w3"] + p["b3"]

    expected = ref(x, params)

    # Default fast path: bf16 MXU inputs, f32 accumulation.
    p_bf16 = pad_params(params, state_size, action_size, use_bf16=True)
    q_bf16 = jax.block_until_ready(neural_network_forward(x, p_bf16, action_size))
    assert q_bf16.shape == (batch, action_size)
    assert jnp.allclose(q_bf16, expected, atol=5e-2, rtol=5e-2)

    # f32-weight path (closer numerics; TPU f32 matmul is still MXU bf16-pass based,
    # so compare with a loose-but-tight-enough tolerance).
    p_f32 = pad_params(params, state_size, action_size, use_bf16=False)
    q_f32 = jax.block_until_ready(neural_network_forward(x, p_f32, action_size))
    assert q_f32.shape == (batch, action_size)
    assert jnp.allclose(q_f32, expected, atol=1e-2, rtol=1e-2)

    print("KERNEL_OK")
</pallas_src>

<mosaic_0001>
module attributes {stable_mosaic.version = 11 : i64} {
  func.func @mlp_kernel(%arg0: i32, %arg1: memref<16x32xbf16, #tpu.memory_space<vmem>>, %arg2: memref<32x512xbf16, #tpu.memory_space<vmem>>, %arg3: memref<1x512xf32, #tpu.memory_space<vmem>>, %arg4: memref<512x512xbf16, #tpu.memory_space<vmem>>, %arg5: memref<1x512xf32, #tpu.memory_space<vmem>>, %arg6: memref<512x128xbf16, #tpu.memory_space<vmem>>, %arg7: memref<1x128xf32, #tpu.memory_space<vmem>>, %arg8: memref<16x128xf32, #tpu.memory_space<vmem>>) attributes {dimension_semantics = [#tpu.dimension_semantics<parallel>], iteration_bounds = array<i64: 1>, scalar_prefetch = 0 : i64, scratch_operands = 0 : i64, tpu.core_type = #tpu.core_type<tc>, window_params = [{transform_indices = @transform_0, window_bounds = array<i64: 16, 32>}, {pipeline_mode = #tpu.pipeline_mode<synchronous>, transform_indices = @transform_1, window_bounds = array<i64: 32, 512>}, {pipeline_mode = #tpu.pipeline_mode<synchronous>, transform_indices = @transform_2, window_bounds = array<i64: 1, 512>}, {pipeline_mode = #tpu.pipeline_mode<synchronous>, transform_indices = @transform_3, window_bounds = array<i64: 512, 512>}, {pipeline_mode = #tpu.pipeline_mode<synchronous>, transform_indices = @transform_4, window_bounds = array<i64: 1, 512>}, {pipeline_mode = #tpu.pipeline_mode<synchronous>, transform_indices = @transform_5, window_bounds = array<i64: 512, 128>}, {pipeline_mode = #tpu.pipeline_mode<synchronous>, transform_indices = @transform_6, window_bounds = array<i64: 1, 128>}, {transform_indices = @transform_7, window_bounds = array<i64: 16, 128>}]} {
    %c0 = arith.constant 0 : index
    %c0_0 = arith.constant 0 : index
    %0 = vector.load %arg1[%c0, %c0_0] : memref<16x32xbf16, #tpu.memory_space<vmem>>, vector<16x32xbf16>
    %c0_1 = arith.constant 0 : index
    %c0_2 = arith.constant 0 : index
    %1 = vector.load %arg2[%c0_1, %c0_2] : memref<32x512xbf16, #tpu.memory_space<vmem>>, vector<32x512xbf16>
    %cst = arith.constant dense<0.000000e+00> : vector<16x512xf32>
    %2 = tpu.matmul %0, %1, %cst {dimension_numbers = #tpu.dot_dimension_numbers<[1], [0], [0], [1], [0, 0, 1, 1], [], []>} : vector<16x32xbf16>, vector<32x512xbf16>, vector<16x512xf32> -> vector<16x512xf32>
    %c0_3 = arith.constant 0 : index
    %c0_4 = arith.constant 0 : index
    %3 = vector.load %arg3[%c0_3, %c0_4] : memref<1x512xf32, #tpu.memory_space<vmem>>, vector<1x512xf32>
    %4 = vector.broadcast %3 : vector<1x512xf32> to vector<16x512xf32>
    %5 = arith.addf %2, %4 : vector<16x512xf32>
    %cst_5 = arith.constant 0.000000e+00 : f32
    %6 = vector.broadcast %cst_5 : f32 to vector<16x512xf32>
    %7 = arith.maximumf %5, %6 : vector<16x512xf32>
    %8 = arith.truncf %7 : vector<16x512xf32> to vector<16x512xbf16>
    %c0_6 = arith.constant 0 : index
    %c0_7 = arith.constant 0 : index
    %9 = vector.load %arg4[%c0_6, %c0_7] : memref<512x512xbf16, #tpu.memory_space<vmem>>, vector<512x512xbf16>
    %cst_8 = arith.constant dense<0.000000e+00> : vector<16x512xf32>
    %10 = tpu.matmul %8, %9, %cst_8 {dimension_numbers = #tpu.dot_dimension_numbers<[1], [0], [0], [1], [0, 0, 1, 1], [], []>} : vector<16x512xbf16>, vector<512x512xbf16>, vector<16x512xf32> -> vector<16x512xf32>
    %c0_9 = arith.constant 0 : index
    %c0_10 = arith.constant 0 : index
    %11 = vector.load %arg5[%c0_9, %c0_10] : memref<1x512xf32, #tpu.memory_space<vmem>>, vector<1x512xf32>
    %12 = vector.broadcast %11 : vector<1x512xf32> to vector<16x512xf32>
    %13 = arith.addf %10, %12 : vector<16x512xf32>
    %cst_11 = arith.constant 0.000000e+00 : f32
    %14 = vector.broadcast %cst_11 : f32 to vector<16x512xf32>
    %15 = arith.maximumf %13, %14 : vector<16x512xf32>
    %16 = arith.truncf %15 : vector<16x512xf32> to vector<16x512xbf16>
    %c0_12 = arith.constant 0 : index
    %c0_13 = arith.constant 0 : index
    %17 = vector.load %arg6[%c0_12, %c0_13] : memref<512x128xbf16, #tpu.memory_space<vmem>>, vector<512x128xbf16>
    %cst_14 = arith.constant dense<0.000000e+00> : vector<16x128xf32>
    %18 = tpu.matmul %16, %17, %cst_14 {dimension_numbers = #tpu.dot_dimension_numbers<[1], [0], [0], [1], [0, 0, 1, 1], [], []>} : vector<16x512xbf16>, vector<512x128xbf16>, vector<16x128xf32> -> vector<16x128xf32>
    %c0_15 = arith.constant 0 : index
    %c0_16 = arith.constant 0 : index
    %19 = vector.load %arg7[%c0_15, %c0_16] : memref<1x128xf32, #tpu.memory_space<vmem>>, vector<1x128xf32>
    %20 = vector.broadcast %19 : vector<1x128xf32> to vector<16x128xf32>
    %21 = arith.addf %18, %20 : vector<16x128xf32>
    %c0_17 = arith.constant 0 : index
    %c0_18 = arith.constant 0 : index
    %22 = vector.load %arg8[%c0_17, %c0_18] : memref<16x128xf32, #tpu.memory_space<vmem>>, vector<16x128xf32>
    tpu.vector_store %arg8[%c0_17, %c0_18], %21 {strides = array<i32>} : memref<16x128xf32, #tpu.memory_space<vmem>>, vector<16x128xf32>,
    return
  }
  func.func @transform_0(%arg0: i32) -> (i32, i32) {
    %c0_i32 = arith.constant 0 : i32
    %c0_i32_0 = arith.constant 0 : i32
    return %arg0, %c0_i32 : i32, i32
  }
  func.func @transform_1(%arg0: i32) -> (i32, i32) {
    %c0_i32 = arith.constant 0 : i32
    %c0_i32_0 = arith.constant 0 : i32
    %c0_i32_1 = arith.constant 0 : i32
    return %c0_i32, %c0_i32_0 : i32, i32
  }
  func.func @transform_2(%arg0: i32) -> (i32, i32) {
    %c0_i32 = arith.constant 0 : i32
    %c0_i32_0 = arith.constant 0 : i32
    %c0_i32_1 = arith.constant 0 : i32
    return %c0_i32, %c0_i32_0 : i32, i32
  }
  func.func @transform_3(%arg0: i32) -> (i32, i32) {
    %c0_i32 = arith.constant 0 : i32
    %c0_i32_0 = arith.constant 0 : i32
    %c0_i32_1 = arith.constant 0 : i32
    return %c0_i32, %c0_i32_0 : i32, i32
  }
  func.func @transform_4(%arg0: i32) -> (i32, i32) {
    %c0_i32 = arith.constant 0 : i32
    %c0_i32_0 = arith.constant 0 : i32
    %c0_i32_1 = arith.constant 0 : i32
    return %c0_i32, %c0_i32_0 : i32, i32
  }
  func.func @transform_5(%arg0: i32) -> (i32, i32) {
    %c0_i32 = arith.constant 0 : i32
    %c0_i32_0 = arith.constant 0 : i32
    %c0_i32_1 = arith.constant 0 : i32
    return %c0_i32, %c0_i32_0 : i32, i32
  }
  func.func @transform_6(%arg0: i32) -> (i32, i32) {
    %c0_i32 = arith.constant 0 : i32
    %c0_i32_0 = arith.constant 0 : i32
    %c0_i32_1 = arith.constant 0 : i32
    return %c0_i32, %c0_i32_0 : i32, i32
  }
  func.func @transform_7(%arg0: i32) -> (i32, i32) {
    %c0_i32 = arith.constant 0 : i32
    %c0_i32_0 = arith.constant 0 : i32
    return %arg0, %c0_i32 : i32, i32
  }
}

</mosaic_0001>

<bundles_post_ra>
// kernel: neural_network_forward.1
= control target key start
LH: loop header
LB: loop body
LE: loop exit
PB: predicated region body
PF: predicated region fallthrough
CT: control target
= control target key end

     0   :  { %12 = vsyncpa [#allocation3], 0  ;;  %s2258_s0 = inlined_call_operand.vmem [shape: bf16[16,32], index: 0, kind: input, shape index: {}]   ;;  %s2259_s1 = inlined_call_operand.hbm [shape: bf16[32,512], index: 1, kind: input, shape index: {}]   ;;  %s2260_s2 = inlined_call_operand.vmem [shape: f32[1,512], index: 2, kind: input, shape index: {}]   ;;  %s2261_s3 = inlined_call_operand.hbm [shape: bf16[512,512], index: 3, kind: input, shape index: {}]   ;;  %s2262_s4 = inlined_call_operand.vmem [shape: f32[1,512], index: 4, kind: input, shape index: {}]   ;;  %s2263_s5 = inlined_call_operand.hbm [shape: bf16[512,128], index: 5, kind: input, shape index: {}]   ;;  %s2264_s6 = inlined_call_operand.vmem [shape: f32[1,128], index: 6, kind: input, shape index: {}]   ;;  %s2265_s7 = inlined_call_operand.vmem [shape: f32[16,128], index: 7, kind: output, shape index: {}]  }
   0x1   :  { %13 = vsyncpa [#allocation5], 0  ;;  %s2121_s24 = smov [#allocation4]   ;;  %s2122_s26 = smov [#allocation2]  }
   0x2   :  { %s35_s25 = sshll.u32 %s2121_s24, 4  ;;  %s21_s27 = sshll.u32 %s2122_s26, 4  ;;  %s36_s25 = int_to_ptr.vmem [resolvable:$true] %s35_s25  ;;  %s2169_s27 = int_to_ptr.vmem [resolvable:$true] %s21_s27 }
   0x3   :  { %s2051_s30 = scalar_lea.hbm %s2261_s3, 16384 }
   0x4   :  { %p2052_p0 = scmp.ne.s32.totalorder %s2261_s3, %s2051_s30  ;;  %p2055_p1 = scmp.lt.u32.totalorder %s2051_s30, %s2261_s3 }
   0x6   :  { %p2057_p2 = pnand %p2055_p1, %p2052_p0 }
   0x8   :  { %2060 = shalt.err (!%p2057_p2)
}
   0x9   :  { %s2061_s12 = scalar_lea.vmem %s36_s25, 16384  ;;  %p2066_p4 = scmp.lt.s32.totalorder %s36_s25, %s36_s25 }
   0xa   :  { %p2062_p3 = scmp.ne.s32.totalorder %s36_s25, %s2061_s12  ;;  %p2067_p5 = scmp.lt.s32.totalorder %s2061_s12, %s2061_s12 }
   0xc   :  { %p2068_p6 = por %p2067_p5, %p2066_p4 }
   0xe   :  { %p2069_p7 = pnand %p2068_p6, %p2062_p3 }
  0x10   :  { %2072 = shalt.err (!%p2069_p7)
}
  0x11   :  { %s2123_s13 = smov 256   ;;  %s2124_s14 = smov 16  }
  0x12   :  { %41 = dma.hbm_to_vmem [thread:$0]  %s2261_s3, 16384, %s36_s25, [#allocation5], %s2123_s13, %s2123_s13, %s2124_s14  }
  0x13   :  { %s2073_s19 = scalar_lea.hbm %s2259_s1, 1024 }
  0x14   :  { %p2074_p8 = scmp.ne.s32.totalorder %s2259_s1, %s2073_s19  ;;  %p2077_p9 = scmp.lt.u32.totalorder %s2073_s19, %s2259_s1 }
  0x16   :  { %p2079_p10 = pnand %p2077_p9, %p2074_p8 }
  0x18   :  { %2082 = shalt.err (!%p2079_p10)
}
  0x19   :  { %s2083_s24 = scalar_lea.vmem %s2169_s27, 1024  ;;  %p2088_p12 = scmp.lt.s32.totalorder %s2169_s27, %s2169_s27 }
  0x1a   :  { %p2084_p11 = scmp.ne.s32.totalorder %s2169_s27, %s2083_s24  ;;  %p2089_p13 = scmp.lt.s32.totalorder %s2083_s24, %s2083_s24 }
  0x1c   :  { %p2090_p0 = por %p2089_p13, %p2088_p12 }
  0x1e   :  { %p2091_p1 = pnand %p2090_p0, %p2084_p11 }
  0x20   :  { %2094 = shalt.err (!%p2091_p1)
}
  0x21   :  { %27 = dma.hbm_to_vmem [thread:$0]  %s2259_s1, 1024, %s2169_s27, [#allocation3], %s2123_s13, %s2123_s13, %s2124_s14  }
  0x22   :  { %s2125_s26 = smov [#allocation6]   ;;  %s2095_s8 = scalar_lea.hbm %s2263_s5, 4096 }
  0x23   :  { %s49_s28 = sshll.u32 %s2125_s26, 4  ;;  %p2096_p2 = scmp.ne.s32.totalorder %s2263_s5, %s2095_s8  ;;  %s50_s28 = int_to_ptr.vmem [resolvable:$true] %s49_s28 }
  0x24   :  { %p2099_p3 = scmp.lt.u32.totalorder %s2095_s8, %s2263_s5 }
  0x26   :  { %p2101_p4 = pnand %p2099_p3, %p2096_p2 }
  0x28   :  { %2104 = shalt.err (!%p2101_p4)
}
  0x29   :  { %s2105_s15 = scalar_lea.vmem %s50_s28, 4096  ;;  %p2110_p6 = scmp.lt.s32.totalorder %s50_s28, %s50_s28 }
  0x2a   :  { %p2106_p5 = scmp.ne.s32.totalorder %s50_s28, %s2105_s15  ;;  %p2111_p7 = scmp.lt.s32.totalorder %s2105_s15, %s2105_s15 }
  0x2c   :  { %p2112_p8 = por %p2111_p7, %p2110_p6 }
  0x2e   :  { %p2113_p9 = pnand %p2112_p8, %p2106_p5 }
  0x30   :  { %2116 = shalt.err (!%p2113_p9)
}
  0x31   :  { %s2126_s1 = smov 64   ;;  %s2127_s27 = smov 4  }
  0x32   :  { %55 = dma.hbm_to_vmem [thread:$0]  %s2263_s5, 4096, %s50_s28, [#allocation5], %s2126_s1, %s2126_s1, %s2127_s27  }
  0x33   :  { %2117 = dma.done.wait [#allocation3], 1024  }
  0x34   :  { %2118 = vsyncadd [#allocation3], 4294966272 }
  0x35   :  { %2119 = dma.done.wait [#allocation5], 20480  }
  0x36   :  { %2120 = vsyncadd [#allocation5], 4294946816  ;;  %v2128_v0 = vmov 0   ;;  %v1814_v1 = vld [vmem:[#allocation2 + $0x4] ss:$16 sps:$4 sm:$0xff]   ;;  %vm145_vm0 = vcmask 261120  }
  0x37   :  { %181 = vmatprep.mubr.bf16.mxu0 %v2128_v0  ;;  %224 = vmatprep.mubr.bf16.mxu1 %v2128_v0  ;;  %v1816_v2 = vld [vmem:[#allocation2] ss:$16 sps:$4 sm:$0xff]   ;;  %v1817_v3 = vld [vmem:[#allocation2 + $0x24] ss:$16 sps:$4 sm:$0xff]   ;;  %v1821_v6 = vld [vmem:[#allocation2 + $0xc] ss:$16 sps:$4 sm:$0xff]  }
  0x38   :  { %149 = vmatprep.subr.bf16.mxu0 %v1814_v1  ;;  %v1819_v4 = vld [vmem:[#allocation2 + $0x20] ss:$16 sps:$4 sm:$0xff]   ;;  %v1823_v7 = vld [vmem:[#allocation2 + $0x8] ss:$16 sps:$4 sm:$0xff]   ;;  %v1824_v8 = vld [vmem:[#allocation2 + $0x2c] ss:$16 sps:$4 sm:$0xff]   ;;  %192 = vmatprep.subr.bf16.mxu1 %v1821_v6 }
  0x39   :  { %150 = vmatpush1.bf16.msra.mxu0 %v1816_v2  ;;  %v1820_v5 = vld [vmem:[%s2258_s0] sm:$0xff]   ;;  %v1826_v9 = vld [vmem:[#allocation2 + $0x28] ss:$16 sps:$4 sm:$0xff]   ;;  %193 = vmatpush1.bf16.msra.mxu1 %v1823_v7  ;;  %v1832_v12 = vld [vmem:[#allocation4 + $0xc] ss:$16 sps:$4 sm:$0xff]  }
  0x3a   :  { %151 = vmatprep.subr.bf16.mxu0 %v1817_v3  ;;  %v1827_v10 = vld [vmem:[#allocation4] ss:$16 sps:$4 sm:$0xff]   ;;  %v1829_v11 = vld [vmem:[#allocation4 + $0x4] ss:$16 sps:$4 sm:$0xff]   ;;  %194 = vmatprep.subr.bf16.mxu1 %v1824_v8  ;;  %v1830_v14 = vld [vmem:[#allocation4 + $0x8] ss:$16 sps:$4 sm:$0xff]  }
  0x3b   :  { %v1835_v13 = vld [vmem:[#allocation4 + $0x24] ss:$16 sps:$4 sm:$0xff]   ;;  %v1833_v15 = vld [vmem:[#allocation4 + $0x20] ss:$16 sps:$4 sm:$0xff]   ;;  %v1838_v16 = vld [vmem:[#allocation4 + $0x2c] ss:$16 sps:$4 sm:$0xff]  }
  0x3c   :  { %v1841_v17 = vld [vmem:[#allocation4 + $0x44] ss:$16 sps:$4 sm:$0xff]   ;;  %v1836_v18 = vld [vmem:[#allocation4 + $0x28] ss:$16 sps:$4 sm:$0xff]   ;;  %v1839_v19 = vld [vmem:[#allocation4 + $0x40] ss:$16 sps:$4 sm:$0xff]  }
  0x3d   :  { %152 = vmatpush1.bf16.msra.mxu0 %v1819_v4  ;;  %195 = vmatpush1.bf16.msra.mxu1 %v1826_v9  ;;  %v1844_v20 = vld [vmem:[#allocation4 + $0x4c] ss:$16 sps:$4 sm:$0xff]   ;;  %v1847_v21 = vld [vmem:[#allocation4 + $0x64] ss:$16 sps:$4 sm:$0xff]   ;;  %v1842_v22 = vld [vmem:[#allocation4 + $0x48] ss:$16 sps:$4 sm:$0xff]  }
  0x3e   :  { %1037 = vmatprep.subr.bf16.mxu0 %v1829_v11  ;;  %1123 = vmatprep.subr.bf16.mxu1 %v1832_v12  ;;  %v1845_v23 = vld [vmem:[#allocation4 + $0x60] ss:$16 sps:$4 sm:$0xff]   ;;  %v1850_v24 = vld [vmem:[#allocation4 + $0x6c] ss:$16 sps:$4 sm:$0xff]   ;;  %v1853_v25 = vld [vmem:[#allocation4 + $0x84] ss:$16 sps:$4 sm:$0xff]   ;;  %v80_v12 = vlaneseq }
  0x3f   :  { %v1848_v26 = vld [vmem:[#allocation4 + $0x68] ss:$16 sps:$4 sm:$0xff]   ;;  %v1851_v27 = vld [vmem:[#allocation4 + $0x80] ss:$16 sps:$4 sm:$0xff]   ;;  %v1856_v28 = vld [vmem:[#allocation4 + $0x8c] ss:$16 sps:$4 sm:$0xff]  }
  0x40   :  { %1583 = vmatmul.mubr.msk.bf16.vlgmr.msra.gmra.mrb[0].mxu0 %vm145_vm0, %v1820_v5  ;;  %1584 = vmatmul.mubr.msk.bf16.vlgmr.msra.gmra.mrb[0].mxu1 %vm145_vm0, %v1820_v5  ;;  %v1859_v29 = vld [vmem:[#allocation4 + $0xa4] ss:$16 sps:$4 sm:$0xff]   ;;  %v1854_v30 = vld [vmem:[#allocation4 + $0x88] ss:$16 sps:$4 sm:$0xff]   ;;  %v1857_v31 = vld [vmem:[#allocation4 + $0xa0] ss:$16 sps:$4 sm:$0xff]  }
  0x41   :  { %1038 = vmatpush1.bf16.msra.mxu0 %v1827_v10  ;;  %1124 = vmatpush1.bf16.msra.mxu1 %v1830_v14  ;;  %v1862_v32 = vld [vmem:[#allocation4 + $0xac] ss:$16 sps:$4 sm:$0xff]   ;;  %v1865_v33 = vld [vmem:[#allocation4 + $0xc4] ss:$16 sps:$4 sm:$0xff]   ;;  %v1860_v34 = vld [vmem:[#allocation4 + $0xa8] ss:$16 sps:$4 sm:$0xff]  }
  0x42   :  { %1039 = vmatprep.subr.bf16.mxu0 %v1835_v13  ;;  %1125 = vmatprep.subr.bf16.mxu1 %v1838_v16  ;;  %v1863_v35 = vld [vmem:[#allocation4 + $0xc0] ss:$16 sps:$4 sm:$0xff]   ;;  %v1868_v36 = vld [vmem:[#allocation4 + $0xcc] ss:$16 sps:$4 sm:$0xff]   ;;  %v1871_v37 = vld [vmem:[#allocation4 + $0xe4] ss:$16 sps:$4 sm:$0xff]  }
  0x43   :  { %v1866_v38 = vld [vmem:[#allocation4 + $0xc8] ss:$16 sps:$4 sm:$0xff]   ;;  %v1869_v39 = vld [vmem:[#allocation4 + $0xe0] ss:$16 sps:$4 sm:$0xff]   ;;  %v1874_v40 = vld [vmem:[#allocation4 + $0xec] ss:$16 sps:$4 sm:$0xff]  }
  0x44   :  { %v1877_v41 = vld [vmem:[#allocation4 + $0x104] ss:$16 sps:$4 sm:$0xff]   ;;  %v1872_v42 = vld [vmem:[#allocation4 + $0xe8] ss:$16 sps:$4 sm:$0xff]   ;;  %v1875_v43 = vld [vmem:[#allocation4 + $0x100] ss:$16 sps:$4 sm:$0xff]  }
  0x45   :  { %1040 = vmatpush1.bf16.msra.mxu0 %v1833_v15  ;;  %1126 = vmatpush1.bf16.msra.mxu1 %v1836_v18  ;;  %v1880_v44 = vld [vmem:[#allocation4 + $0x10c] ss:$16 sps:$4 sm:$0xff]   ;;  %v1883_v45 = vld [vmem:[#allocation4 + $0x124] ss:$16 sps:$4 sm:$0xff]   ;;  %v1878_v46 = vld [vmem:[#allocation4 + $0x108] ss:$16 sps:$4 sm:$0xff]  }
  0x46   :  { %1041 = vmatprep.subr.bf16.mxu0 %v1841_v17  ;;  %1127 = vmatprep.subr.bf16.mxu1 %v1844_v20  ;;  %v1881_v47 = vld [vmem:[#allocation4 + $0x120] ss:$16 sps:$4 sm:$0xff]   ;;  %v1886_v48 = vld [vmem:[#allocation4 + $0x12c] ss:$16 sps:$4 sm:$0xff]   ;;  %v1889_v49 = vld [vmem:[#allocation4 + $0x144] ss:$16 sps:$4 sm:$0xff]  }
  0x47   :  { %v1884_v50 = vld [vmem:[#allocation4 + $0x128] ss:$16 sps:$4 sm:$0xff]   ;;  %v1887_v51 = vld [vmem:[#allocation4 + $0x140] ss:$16 sps:$4 sm:$0xff]   ;;  %v1892_v52 = vld [vmem:[#allocation4 + $0x14c] ss:$16 sps:$4 sm:$0xff]  }
  0x48   :  { %v1895_v53 = vld [vmem:[#allocation4 + $0x164] ss:$16 sps:$4 sm:$0xff]   ;;  %v1890_v54 = vld [vmem:[#allocation4 + $0x148] ss:$16 sps:$4 sm:$0xff]   ;;  %v1893_v55 = vld [vmem:[#allocation4 + $0x160] ss:$16 sps:$4 sm:$0xff]  }
  0x49   :  { %1042 = vmatpush1.bf16.msra.mxu0 %v1839_v19  ;;  %1128 = vmatpush1.bf16.msra.mxu1 %v1842_v22  ;;  %v1898_v56 = vld [vmem:[#allocation4 + $0x16c] ss:$16 sps:$4 sm:$0xff]   ;;  %v1901_v57 = vld [vmem:[#allocation4 + $0x184] ss:$16 sps:$4 sm:$0xff]   ;;  %v1896_v58 = vld [vmem:[#allocation4 + $0x168] ss:$16 sps:$4 sm:$0xff]  }
  0x4a   :  { %1043 = vmatprep.subr.bf16.mxu0 %v1847_v21  ;;  %1129 = vmatprep.subr.bf16.mxu1 %v1850_v24  ;;  %v1899_v59 = vld [vmem:[#allocation4 + $0x180] ss:$16 sps:$4 sm:$0xff]   ;;  %v1904_v60 = vld [vmem:[#allocation4 + $0x18c] ss:$16 sps:$4 sm:$0xff]   ;;  %v1907_v61 = vld [vmem:[#allocation4 + $0x1a4] ss:$16 sps:$4 sm:$0xff]  }
  0x4b   :  { %v1902_v62 = vld [vmem:[#allocation4 + $0x188] ss:$16 sps:$4 sm:$0xff]   ;;  %v1905_v63 = vld [vmem:[#allocation4 + $0x1a0] ss:$16 sps:$4 sm:$0xff]   ;;  %v1910_v0 = vld [vmem:[#allocation4 + $0x1ac] ss:$16 sps:$4 sm:$0xff]  }
  0x4c   :  { %v1908_v1 = vld [vmem:[#allocation4 + $0x1a8] ss:$16 sps:$4 sm:$0xff]   ;;  %v1913_v2 = vld [vmem:[#allocation4 + $0x1c4] ss:$16 sps:$4 sm:$0xff]   ;;  %v1916_v3 = vld [vmem:[#allocation4 + $0x1cc] ss:$16 sps:$4 sm:$0xff]  }
  0x4d   :  { %1044 = vmatpush1.bf16.msra.mxu0 %v1845_v23  ;;  %1130 = vmatpush1.bf16.msra.mxu1 %v1848_v26  ;;  %v1911_v4 = vld [vmem:[#allocation4 + $0x1c0] ss:$16 sps:$4 sm:$0xff]   ;;  %v1914_v5 = vld [vmem:[#allocation4 + $0x1c8] ss:$16 sps:$4 sm:$0xff]   ;;  %v1919_v6 = vld [vmem:[#allocation4 + $0x1e4] ss:$16 sps:$4 sm:$0xff]  }
  0x4e   :  { %1045 = vmatprep.subr.bf16.mxu0 %v1853_v25  ;;  %1131 = vmatprep.subr.bf16.mxu1 %v1856_v28  ;;  %v1922_v7 = vld [vmem:[#allocation4 + $0x1ec] ss:$16 sps:$4 sm:$0xff]   ;;  %v1917_v8 = vld [vmem:[#allocation4 + $0x1e0] ss:$16 sps:$4 sm:$0xff]   ;;  %v1920_v9 = vld [vmem:[#allocation4 + $0x1e8] ss:$16 sps:$4 sm:$0xff]  }
  0x4f   :  { %v1925_v10 = vld [vmem:[#allocation4 + $0x204] ss:$16 sps:$4 sm:$0xff]   ;;  %v1928_v11 = vld [vmem:[#allocation4 + $0x20c] ss:$16 sps:$4 sm:$0xff]   ;;  %v2217_v13 = vshrl.u32 %v80_v12, 7 }
  0x50   :  { %v78_v15 = vld [vmem:[%s2260_s2] sm:$0xf]  ;;  %v1962_v12 = vld [vmem:[#allocation4 + $0x2c8] ss:$16 sps:$4 sm:$0xff]  }
  0x51   :  { %1046 = vmatpush1.bf16.msra.mxu0 %v1851_v27  ;;  %1132 = vmatpush1.bf16.msra.mxu1 %v1854_v30  ;;  %v82_v14 = vsub.s32 0, %v2217_v13  ;;  %v86_v16 = vsub.s32 1, %v2217_v13  ;;  %v90_v18 = vsub.s32 2, %v2217_v13  ;;  %v94_v20 = vsub.s32 3, %v2217_v13 }
  0x52   :  { %1047 = vmatprep.subr.bf16.mxu0 %v1859_v29  ;;  %1133 = vmatprep.subr.bf16.mxu1 %v1862_v32 }
  0x53   :  { %v83_v17 = vrot.slane %v78_v15, %v82_v14  ;;  %v87_v19 = vrot.slane %v78_v15, %v86_v16  ;;  %v91_v24 = vrot.slane %v78_v15, %v90_v18  ;;  %v95_v27 = vrot.slane %v78_v15, %v94_v20  ;;  %v1967_v15 = vld [vmem:[#allocation4 + $0x2e4] ss:$16 sps:$4 sm:$0xff]  }
  0x55   :  { %1048 = vmatpush1.bf16.msra.mxu0 %v1857_v31  ;;  %1134 = vmatpush1.bf16.msra.mxu1 %v1860_v34 }
  0x56   :  { %1049 = vmatprep.subr.bf16.mxu0 %v1865_v33  ;;  %1135 = vmatprep.subr.bf16.mxu1 %v1868_v36 }
  0x59   :  { %1050 = vmatpush1.bf16.msra.mxu0 %v1863_v35  ;;  %1136 = vmatpush1.bf16.msra.mxu1 %v1866_v38 }
  0x5a   :  { %1051 = vmatprep.subr.bf16.mxu0 %v1871_v37  ;;  %1137 = vmatprep.subr.bf16.mxu1 %v1874_v40 }
  0x5d   :  { %1052 = vmatpush1.bf16.msra.mxu0 %v1869_v39  ;;  %1138 = vmatpush1.bf16.msra.mxu1 %v1872_v42 }
  0x5e   :  { %1053 = vmatprep.subr.bf16.mxu0 %v1877_v41  ;;  %1139 = vmatprep.subr.bf16.mxu1 %v1880_v44 }
  0x61   :  { %1054 = vmatpush1.bf16.msra.mxu0 %v1875_v43  ;;  %1140 = vmatpush1.bf16.msra.mxu1 %v1878_v46  ;;  %v1926_v46 = vld [vmem:[#allocation4 + $0x208] ss:$16 sps:$4 sm:$0xff]  }
  0x62   :  { %1055 = vmatprep.subr.bf16.mxu0 %v1883_v45  ;;  %1141 = vmatprep.subr.bf16.mxu1 %v1886_v48  ;;  %v1923_v45 = vld [vmem:[#allocation4 + $0x200] ss:$16 sps:$4 sm:$0xff]  }
  0x65   :  { %1056 = vmatpush1.bf16.msra.mxu0 %v1881_v47  ;;  %1142 = vmatpush1.bf16.msra.mxu1 %v1884_v50  ;;  %v1934_v50 = vld [vmem:[#allocation4 + $0x22c] ss:$16 sps:$4 sm:$0xff]  }
  0x66   :  { %1057 = vmatprep.subr.bf16.mxu0 %v1889_v49  ;;  %1143 = vmatprep.subr.bf16.mxu1 %v1892_v52  ;;  %v1931_v49 = vld [vmem:[#allocation4 + $0x224] ss:$16 sps:$4 sm:$0xff]  }
  0x69   :  { %1058 = vmatpush1.bf16.msra.mxu0 %v1887_v51  ;;  %1144 = vmatpush1.bf16.msra.mxu1 %v1890_v54  ;;  %v1929_v54 = vld [vmem:[#allocation4 + $0x220] ss:$16 sps:$4 sm:$0xff]  }
  0x6a   :  { %1059 = vmatprep.subr.bf16.mxu0 %v1895_v53  ;;  %1145 = vmatprep.subr.bf16.mxu1 %v1898_v56 }
  0x6d   :  { %1060 = vmatpush1.bf16.msra.mxu0 %v1893_v55  ;;  %1146 = vmatpush1.bf16.msra.mxu1 %v1896_v58  ;;  %v1932_v55 = vld [vmem:[#allocation4 + $0x228] ss:$16 sps:$4 sm:$0xff]   ;;  %v1940_v58 = vld [vmem:[#allocation4 + $0x24c] ss:$16 sps:$4 sm:$0xff]  }
  0x6e   :  { %1061 = vmatprep.subr.bf16.mxu0 %v1901_v57  ;;  %1147 = vmatprep.subr.bf16.mxu1 %v1904_v60  ;;  %v1937_v57 = vld [vmem:[#allocation4 + $0x244] ss:$16 sps:$4 sm:$0xff]   ;;  %v1938_v60 = vld [vmem:[#allocation4 + $0x248] ss:$16 sps:$4 sm:$0xff]  }
  0x71   :  { %1062 = vmatpush1.bf16.msra.mxu0 %v1899_v59  ;;  %1148 = vmatpush1.bf16.msra.mxu1 %v1902_v62  ;;  %v1935_v59 = vld [vmem:[#allocation4 + $0x240] ss:$16 sps:$4 sm:$0xff]   ;;  %v1946_v62 = vld [vmem:[#allocation4 + $0x26c] ss:$16 sps:$4 sm:$0xff]  }
  0x72   :  { %1063 = vmatprep.subr.bf16.mxu0 %v1907_v61  ;;  %1149 = vmatprep.subr.bf16.mxu1 %v1910_v0  ;;  %v1943_v61 = vld [vmem:[#allocation4 + $0x264] ss:$16 sps:$4 sm:$0xff]   ;;  %v1944_v0 = vld [vmem:[#allocation4 + $0x268] ss:$16 sps:$4 sm:$0xff]  }
  0x75   :  { %1064 = vmatpush1.bf16.msra.mxu0 %v1905_v63  ;;  %1150 = vmatpush1.bf16.msra.mxu1 %v1908_v1  ;;  %v1941_v63 = vld [vmem:[#allocation4 + $0x260] ss:$16 sps:$4 sm:$0xff]   ;;  %v1949_v1 = vld [vmem:[#allocation4 + $0x284] ss:$16 sps:$4 sm:$0xff]  }
  0x76   :  { %1065 = vmatprep.subr.bf16.mxu0 %v1913_v2  ;;  %1151 = vmatprep.subr.bf16.mxu1 %v1916_v3  ;;  %v1952_v2 = vld [vmem:[#allocation4 + $0x28c] ss:$16 sps:$4 sm:$0xff]   ;;  %v1947_v3 = vld [vmem:[#allocation4 + $0x280] ss:$16 sps:$4 sm:$0xff]  }
  0x79   :  { %1066 = vmatpush1.bf16.msra.mxu0 %v1911_v4  ;;  %1152 = vmatpush1.bf16.msra.mxu1 %v1914_v5  ;;  %v1950_v4 = vld [vmem:[#allocation4 + $0x288] ss:$16 sps:$4 sm:$0xff]   ;;  %v1955_v5 = vld [vmem:[#allocation4 + $0x2a4] ss:$16 sps:$4 sm:$0xff]  }
  0x7a   :  { %1067 = vmatprep.subr.bf16.mxu0 %v1919_v6  ;;  %1153 = vmatprep.subr.bf16.mxu1 %v1922_v7  ;;  %v1958_v6 = vld [vmem:[#allocation4 + $0x2ac] ss:$16 sps:$4 sm:$0xff]   ;;  %v1953_v7 = vld [vmem:[#allocation4 + $0x2a0] ss:$16 sps:$4 sm:$0xff]  }
  0x7d   :  { %1068 = vmatpush1.bf16.msra.mxu0 %v1917_v8  ;;  %1154 = vmatpush1.bf16.msra.mxu1 %v1920_v9  ;;  %v1956_v8 = vld [vmem:[#allocation4 + $0x2a8] ss:$16 sps:$4 sm:$0xff]   ;;  %v1961_v9 = vld [vmem:[#allocation4 + $0x2c4] ss:$16 sps:$4 sm:$0xff]  }
  0x7e   :  { %1080 = vmatprep.subr.bf16.mxu0 %v1925_v10  ;;  %1166 = vmatprep.subr.bf16.mxu1 %v1928_v11  ;;  %v1964_v10 = vld [vmem:[#allocation4 + $0x2cc] ss:$16 sps:$4 sm:$0xff]   ;;  %v1959_v11 = vld [vmem:[#allocation4 + $0x2c0] ss:$16 sps:$4 sm:$0xff]  }
 0x113   :  { %v183_v21 = vpop.f32.mrb[0].mxu0  ;;  %v226_v31 = vpop.f32.mrb[0].mxu1 }
 0x114   :  { %v184_v22 = vadd.f32 %v183_v21, %v83_v17  ;;  %v185_v23 = vpop.f32.mrb[1].mxu0  ;;  %v227_v34 = vadd.f32 %v226_v31, %v91_v24  ;;  %v228_v35 = vpop.f32.mrb[1].mxu1  ;;  %v1968_v21 = vld [vmem:[#allocation4 + $0x2e8] ss:$16 sps:$4 sm:$0xff]   ;;  %v1988_v31 = vld [vmem:[#allocation4 + $0x34c] ss:$16 sps:$4 sm:$0xff]  }
 0x115   :  { %v186_v25 = vadd.f32 %v185_v23, %v87_v19  ;;  %v187_v26 = vpop.f32.mrb[2].mxu0  ;;  %v229_v38 = vadd.f32 %v228_v35, %v95_v27  ;;  %v230_v39 = vpop.f32.mrb[2].mxu1  ;;  %v1976_v23 = vld [vmem:[#allocation4 + $0x30c] ss:$16 sps:$4 sm:$0xff]  }
 0x116   :  { %v188_v28 = vadd.f32 %v187_v26, %v83_v17  ;;  %v189_v29 = vpop.f32.mrb[3].mxu0  ;;  %v235_v32 = vmax.f32 %v184_v22, 0.0  ;;  %v237_v41 = vmax.f32 %v227_v34, 0.0  ;;  %v231_v42 = vadd.f32 %v230_v39, %v91_v24  ;;  %v232_v43 = vpop.f32.mrb[3].mxu1  ;;  %v1970_v17 = vld [vmem:[#allocation4 + $0x2ec] ss:$16 sps:$4 sm:$0xff]  }
 0x117   :  { %v190_v30 = vadd.f32 %v189_v29, %v87_v19  ;;  %v236_v36 = vmax.f32 %v186_v25, 0.0  ;;  %v238_v47 = vmax.f32 %v229_v38, 0.0  ;;  %v233_v48 = vadd.f32 %v232_v43, %v95_v27  ;;  %v1965_v19 = vld [vmem:[#allocation4 + $0x2e0] ss:$16 sps:$4 sm:$0xff]   ;;  %v1973_v22 = vld [vmem:[#allocation4 + $0x304] ss:$16 sps:$4 sm:$0xff]  }
 0x118   :  { %v239_v33 = vmax.f32 %v188_v28, 0.0  ;;  %v241_v51 = vmax.f32 %v231_v42, 0.0  ;;  %v1971_v24 = vld [vmem:[#allocation4 + $0x300] ss:$16 sps:$4 sm:$0xff]   ;;  %v1974_v25 = vld [vmem:[#allocation4 + $0x308] ss:$16 sps:$4 sm:$0xff]  }
 0x119   :  { %v240_v37 = vmax.f32 %v190_v30, 0.0  ;;  %v242_v52 = vmax.f32 %v233_v48, 0.0  ;;  %v1979_v26 = vld [vmem:[#allocation4 + $0x324] ss:$16 sps:$4 sm:$0xff]   ;;  %v1982_v27 = vld [vmem:[#allocation4 + $0x32c] ss:$16 sps:$4 sm:$0xff]  }
 0x11a   :  { %v243_v40 = vpack.c.bf16 %v239_v33, %v235_v32  ;;  %v2234_v53 = vpack.c.bf16 %v241_v51, %v237_v41  ;;  %v1977_v28 = vld [vmem:[#allocation4 + $0x320] ss:$16 sps:$4 sm:$0xff]   ;;  %v1980_v29 = vld [vmem:[#allocation4 + $0x328] ss:$16 sps:$4 sm:$0xff]   ;;  %v1985_v30 = vld [vmem:[#allocation4 + $0x344] ss:$16 sps:$4 sm:$0xff]  }
 0x11b   :  { %v244_v44 = vpack.c.bf16 %v240_v37, %v236_v36  ;;  %v246_v56 = vpack.c.bf16 %v242_v52, %v238_v47  ;;  %v1983_v32 = vld [vmem:[#allocation4 + $0x340] ss:$16 sps:$4 sm:$0xff]   ;;  %v1986_v33 = vld [vmem:[#allocation4 + $0x348] ss:$16 sps:$4 sm:$0xff]   ;;  %v1991_v34 = vld [vmem:[#allocation4 + $0x364] ss:$16 sps:$4 sm:$0xff]  }
 0x11c   :  { %v1994_v35 = vld [vmem:[#allocation4 + $0x36c] ss:$16 sps:$4 sm:$0xff]   ;;  %v1989_v36 = vld [vmem:[#allocation4 + $0x360] ss:$16 sps:$4 sm:$0xff]   ;;  %v1992_v37 = vld [vmem:[#allocation4 + $0x368] ss:$16 sps:$4 sm:$0xff]  }
 0x11d   :  { %1069 = vmatprep.mubr.bf16.mxu0 %v244_v44  ;;  %1155 = vmatprep.mubr.bf16.mxu1 %v244_v44  ;;  %v1997_v38 = vld [vmem:[#allocation4 + $0x384] ss:$16 sps:$4 sm:$0xff]   ;;  %v2000_v39 = vld [vmem:[#allocation4 + $0x38c] ss:$16 sps:$4 sm:$0xff]   ;;  %v1998_v41 = vld [vmem:[#allocation4 + $0x388] ss:$16 sps:$4 sm:$0xff]  }
 0x11e   :  { %1070 = vmatmul.mubr.bf16.vlgmr.msra.gmra.mrb[4].mxu0 %v243_v40  ;;  %1156 = vmatmul.mubr.bf16.vlgmr.msra.gmra.mrb[4].mxu1 %v243_v40  ;;  %v1995_v40 = vld [vmem:[#allocation4 + $0x380] ss:$16 sps:$4 sm:$0xff]   ;;  %v2003_v42 = vld [vmem:[#allocation4 + $0x3a4] ss:$16 sps:$4 sm:$0xff]   ;;  %v2006_v43 = vld [vmem:[#allocation4 + $0x3ac] ss:$16 sps:$4 sm:$0xff]  }
 0x11f   :  { %1081 = vmatpush1.bf16.msra.mxu0 %v1923_v45  ;;  %1167 = vmatpush1.bf16.msra.mxu1 %v1926_v46  ;;  %v2001_v44 = vld [vmem:[#allocation4 + $0x3a0] ss:$16 sps:$4 sm:$0xff]   ;;  %v2004_v45 = vld [vmem:[#allocation4 + $0x3a8] ss:$16 sps:$4 sm:$0xff]   ;;  %v2009_v46 = vld [vmem:[#allocation4 + $0x3c4] ss:$16 sps:$4 sm:$0xff]  }
 0x120   :  { %1082 = vmatprep.subr.bf16.mxu0 %v1931_v49  ;;  %1168 = vmatprep.subr.bf16.mxu1 %v1934_v50  ;;  %v2012_v47 = vld [vmem:[#allocation4 + $0x3cc] ss:$16 sps:$4 sm:$0xff]   ;;  %v2007_v48 = vld [vmem:[#allocation4 + $0x3c0] ss:$16 sps:$4 sm:$0xff]   ;;  %v2010_v49 = vld [vmem:[#allocation4 + $0x3c8] ss:$16 sps:$4 sm:$0xff]  }
 0x121   :  { %1112 = vmatprep.mubr.bf16.mxu0 %v246_v56  ;;  %1198 = vmatprep.mubr.bf16.mxu1 %v246_v56  ;;  %v2015_v50 = vld [vmem:[#allocation4 + $0x3e4] ss:$16 sps:$4 sm:$0xff]   ;;  %v2018_v51 = vld [vmem:[#allocation4 + $0x3ec] ss:$16 sps:$4 sm:$0xff]   ;;  %v2013_v52 = vld [vmem:[#allocation4 + $0x3e0] ss:$16 sps:$4 sm:$0xff]  }
 0x122   :  { %v2020_v56 = vld [vmem:[#allocation6 + $0xc0] sm:$0xff]  }
 0x123   :  { %1083 = vmatpush1.bf16.msra.mxu0 %v1929_v54  ;;  %1169 = vmatpush1.bf16.msra.mxu1 %v1932_v55  ;;  %v2016_v54 = vld [vmem:[#allocation4 + $0x3e8] ss:$16 sps:$4 sm:$0xff]   ;;  %v2019_v55 = vld [vmem:[#allocation6 + $0x40] sm:$0xff]  }
 0x124   :  { %1084 = vmatprep.subr.bf16.mxu0 %v1937_v57  ;;  %1170 = vmatprep.subr.bf16.mxu1 %v1940_v58  ;;  %v2021_v57 = vld [vmem:[#allocation6] sm:$0xff]  }
 0x125   :  { %v2022_v58 = vld [vmem:[#allocation6 + $0x80] sm:$0xff]  }
 0x127   :  { %1085 = vmatpush1.bf16.msra.mxu0 %v1935_v59  ;;  %1171 = vmatpush1.bf16.msra.mxu1 %v1938_v60  ;;  %v2023_v59 = vld [vmem:[#allocation6 + $0x48] sm:$0xff]  }
 0x128   :  { %1086 = vmatprep.subr.bf16.mxu0 %v1943_v61  ;;  %1172 = vmatprep.subr.bf16.mxu1 %v1946_v62  ;;  %v2024_v60 = vld [vmem:[#allocation6 + $0xc8] sm:$0xff]  }
 0x129   :  { %v2025_v61 = vld [vmem:[#allocation6 + $0x8] sm:$0xff]  }
 0x12a   :  { %v2026_v62 = vld [vmem:[#allocation6 + $0x88] sm:$0xff]  }
 0x12b   :  { %1087 = vmatpush1.bf16.msra.mxu0 %v1941_v63  ;;  %1173 = vmatpush1.bf16.msra.mxu1 %v1944_v0  ;;  %v2027_v63 = vld [vmem:[#allocation6 + $0x50] sm:$0xff]  }
 0x12c   :  { %1088 = vmatprep.subr.bf16.mxu0 %v1949_v1  ;;  %1174 = vmatprep.subr.bf16.mxu1 %v1952_v2  ;;  %v2028_v0 = vld [vmem:[#allocation6 + $0xd0] sm:$0xff]  }
 0x12d   :  { %v2029_v1 = vld [vmem:[#allocation6 + $0x10] sm:$0xff]  }
 0x12e   :  { %v2030_v2 = vld [vmem:[#allocation6 + $0x90] sm:$0xff]  }
 0x12f   :  { %1089 = vmatpush1.bf16.msra.mxu0 %v1947_v3  ;;  %1175 = vmatpush1.bf16.msra.mxu1 %v1950_v4  ;;  %v2031_v3 = vld [vmem:[#allocation6 + $0x58] sm:$0xff]  }
 0x130   :  { %1090 = vmatprep.subr.bf16.mxu0 %v1955_v5  ;;  %1176 = vmatprep.subr.bf16.mxu1 %v1958_v6  ;;  %v2032_v4 = vld [vmem:[#allocation6 + $0xd8] sm:$0xff]   ;;  %v2035_v6 = vld [vmem:[#allocation6 + $0x60] sm:$0xff]  }
 0x131   :  { %v2033_v5 = vld [vmem:[#allocation6 + $0x18] sm:$0xff]  }
 0x133   :  { %1091 = vmatpush1.bf16.msra.mxu0 %v1953_v7  ;;  %1177 = vmatpush1.bf16.msra.mxu1 %v1956_v8  ;;  %v2036_v7 = vld [vmem:[#allocation6 + $0xe0] sm:$0xff]  }
 0x134   :  { %1092 = vmatprep.subr.bf16.mxu0 %v1961_v9  ;;  %1178 = vmatprep.subr.bf16.mxu1 %v1964_v10  ;;  %v2037_v8 = vld [vmem:[#allocation6 + $0x20] sm:$0xff]   ;;  %v2039_v10 = vld [vmem:[#allocation6 + $0x68] sm:$0xff]  }
 0x135   :  { %v2038_v9 = vld [vmem:[#allocation6 + $0xa0] sm:$0xff]  }
 0x137   :  { %1093 = vmatpush1.bf16.msra.mxu0 %v1959_v11  ;;  %1179 = vmatpush1.bf16.msra.mxu1 %v1962_v12  ;;  %v2040_v11 = vld [vmem:[#allocation6 + $0xe8] sm:$0xff]  }
 0x138   :  { %1094 = vmatprep.subr.bf16.mxu0 %v1967_v15  ;;  %1180 = vmatprep.subr.bf16.mxu1 %v1970_v17  ;;  %v2041_v12 = vld [vmem:[#allocation6 + $0x28] sm:$0xff]   ;;  %v2043_v17 = vld [vmem:[#allocation6 + $0x70] sm:$0xff]  }
 0x139   :  { %v2042_v15 = vld [vmem:[#allocation6 + $0xa8] sm:$0xff]  }
 0x13b   :  { %1095 = vmatpush1.bf16.msra.mxu0 %v1965_v19  ;;  %1181 = vmatpush1.bf16.msra.mxu1 %v1968_v21  ;;  %v2044_v19 = vld [vmem:[#allocation6 + $0xf0] sm:$0xff]  }
 0x13c   :  { %1096 = vmatprep.subr.bf16.mxu0 %v1973_v22  ;;  %1182 = vmatprep.subr.bf16.mxu1 %v1976_v23  ;;  %v2045_v21 = vld [vmem:[#allocation6 + $0x30] sm:$0xff]   ;;  %v2047_v23 = vld [vmem:[#allocation6 + $0x78] sm:$0xff]  }
 0x13d   :  { %v2046_v22 = vld [vmem:[#allocation6 + $0xb0] sm:$0xff]  }
 0x13f   :  { %1097 = vmatpush1.bf16.msra.mxu0 %v1971_v24  ;;  %1183 = vmatpush1.bf16.msra.mxu1 %v1974_v25  ;;  %v2048_v24 = vld [vmem:[#allocation6 + $0xf8] sm:$0xff]  }
 0x140   :  { %1098 = vmatprep.subr.bf16.mxu0 %v1979_v26  ;;  %1184 = vmatprep.subr.bf16.mxu1 %v1982_v27  ;;  %v2049_v25 = vld [vmem:[#allocation6 + $0x38] sm:$0xff]   ;;  %v375_v27 = vld [vmem:[%s2262_s4] sm:$0xf] }
 0x141   :  { %v2050_v26 = vld [vmem:[#allocation6 + $0xb8] sm:$0xff]  }
 0x143   :  { %1099 = vmatpush1.bf16.msra.mxu0 %v1977_v28  ;;  %1185 = vmatpush1.bf16.msra.mxu1 %v1980_v29  ;;  %v380_v28 = vrot.slane %v375_v27, %v82_v14  ;;  %v388_v29 = vrot.slane %v375_v27, %v90_v18 }
 0x144   :  { %1100 = vmatprep.subr.bf16.mxu0 %v1985_v30  ;;  %1186 = vmatprep.subr.bf16.mxu1 %v1988_v31  ;;  %v384_v30 = vrot.slane %v375_v27, %v86_v16  ;;  %v392_v31 = vrot.slane %v375_v27, %v94_v20 }
 0x147   :  { %1101 = vmatpush1.bf16.msra.mxu0 %v1983_v32  ;;  %1187 = vmatpush1.bf16.msra.mxu1 %v1986_v33 }
 0x148   :  { %1102 = vmatprep.subr.bf16.mxu0 %v1991_v34  ;;  %1188 = vmatprep.subr.bf16.mxu1 %v1994_v35 }
 0x14b   :  { %1103 = vmatpush1.bf16.msra.mxu0 %v1989_v36  ;;  %1189 = vmatpush1.bf16.msra.mxu1 %v1992_v37 }
 0x14c   :  { %1104 = vmatprep.subr.bf16.mxu0 %v1997_v38  ;;  %1190 = vmatprep.subr.bf16.mxu1 %v2000_v39 }
 0x14f   :  { %1105 = vmatpush1.bf16.msra.mxu0 %v1995_v40  ;;  %1191 = vmatpush1.bf16.msra.mxu1 %v1998_v41 }
 0x150   :  { %1106 = vmatprep.subr.bf16.mxu0 %v2003_v42  ;;  %1192 = vmatprep.subr.bf16.mxu1 %v2006_v43 }
 0x153   :  { %1107 = vmatpush1.bf16.msra.mxu0 %v2001_v44  ;;  %1193 = vmatpush1.bf16.msra.mxu1 %v2004_v45 }
 0x154   :  { %1108 = vmatprep.subr.bf16.mxu0 %v2009_v46  ;;  %1194 = vmatprep.subr.bf16.mxu1 %v2012_v47 }
 0x157   :  { %1109 = vmatpush1.bf16.msra.mxu0 %v2007_v48  ;;  %1195 = vmatpush1.bf16.msra.mxu1 %v2010_v49 }
 0x158   :  { %1110 = vmatprep.subr.bf16.mxu0 %v2015_v50  ;;  %1196 = vmatprep.subr.bf16.mxu1 %v2018_v51 }
 0x15b   :  { %1111 = vmatpush1.bf16.msra.mxu0 %v2013_v52  ;;  %1197 = vmatpush1.bf16.msra.mxu1 %v2016_v54 }
 0x15c   :  { %1746 = vmatprep.subr.bf16.mxu0 %v2019_v55  ;;  %1768 = vmatprep.subr.bf16.mxu1 %v2020_v56 }
 0x15e   :  { %1113 = vmatmul.mubr.bf16.vlgmr.msra.gmra.mrb[4].mxu0 %v2234_v53  ;;  %1199 = vmatmul.mubr.bf16.vlgmr.msra.gmra.mrb[4].mxu1 %v2234_v53  ;;  %v2034_v53 = vld [vmem:[#allocation6 + $0x98] sm:$0xff]  }
 0x15f   :  { %1747 = vmatpush3.bf16.msra.mxu0 %v2021_v57  ;;  %1769 = vmatpush3.bf16.msra.mxu1 %v2022_v58  ;;  %v1713_v58 = vld [vmem:[%s2264_s6] ss:$0 sm:$0xff] }
 0x160   :  { %1748 = vmatprep.subr.bf16.mxu0 %v2023_v59  ;;  %1770 = vmatprep.subr.bf16.mxu1 %v2024_v60 }
 0x163   :  { %1749 = vmatpush3.bf16.msra.mxu0 %v2025_v61  ;;  %1771 = vmatpush3.bf16.msra.mxu1 %v2026_v62 }
 0x164   :  { %1750 = vmatprep.subr.bf16.mxu0 %v2027_v63  ;;  %1772 = vmatprep.subr.bf16.mxu1 %v2028_v0 }
 0x167   :  { %1751 = vmatpush3.bf16.msra.mxu0 %v2029_v1  ;;  %1773 = vmatpush3.bf16.msra.mxu1 %v2030_v2 }
 0x168   :  { %1752 = vmatprep.subr.bf16.mxu0 %v2031_v3  ;;  %1774 = vmatprep.subr.bf16.mxu1 %v2032_v4 }
 0x16b   :  { %1753 = vmatpush3.bf16.msra.mxu0 %v2033_v5  ;;  %1775 = vmatpush3.bf16.msra.mxu1 %v2034_v53 }
 0x16c   :  { %1754 = vmatprep.subr.bf16.mxu0 %v2035_v6  ;;  %1776 = vmatprep.subr.bf16.mxu1 %v2036_v7 }
 0x16f   :  { %1755 = vmatpush3.bf16.msra.mxu0 %v2037_v8  ;;  %1777 = vmatpush3.bf16.msra.mxu1 %v2038_v9 }
 0x170   :  { %1756 = vmatprep.subr.bf16.mxu0 %v2039_v10  ;;  %1778 = vmatprep.subr.bf16.mxu1 %v2040_v11 }
 0x173   :  { %1757 = vmatpush3.bf16.msra.mxu0 %v2041_v12  ;;  %1779 = vmatpush3.bf16.msra.mxu1 %v2042_v15 }
 0x174   :  { %1758 = vmatprep.subr.bf16.mxu0 %v2043_v17  ;;  %1780 = vmatprep.subr.bf16.mxu1 %v2044_v19 }
 0x177   :  { %1759 = vmatpush3.bf16.msra.mxu0 %v2045_v21  ;;  %1781 = vmatpush3.bf16.msra.mxu1 %v2046_v22 }
 0x178   :  { %1760 = vmatprep.subr.bf16.mxu0 %v2047_v23  ;;  %1782 = vmatprep.subr.bf16.mxu1 %v2048_v24 }
 0x17b   :  { %1761 = vmatpush3.bf16.msra.mxu0 %v2049_v25  ;;  %1783 = vmatpush3.bf16.msra.mxu1 %v2050_v26 }
 0x231   :  { %v1114_v32 = vpop.f32.mrb[4].mxu0  ;;  %v1200_v33 = vpop.f32.mrb[4].mxu1 }
 0x232   :  { %v1790_v34 = vadd.f32 %v1114_v32, %v380_v28  ;;  %v1794_v35 = vadd.f32 %v1200_v33, %v388_v29  ;;  %v1116_v36 = vpop.f32.mrb[5].mxu0  ;;  %v1202_v37 = vpop.f32.mrb[5].mxu1 }
 0x233   :  { %v1791_v38 = vadd.f32 %v1116_v36, %v384_v30  ;;  %v1795_v39 = vadd.f32 %v1202_v37, %v392_v31  ;;  %v1118_v40 = vpop.f32.mrb[6].mxu0  ;;  %v1204_v41 = vpop.f32.mrb[6].mxu1 }
 0x234   :  { %v1792_v14 = vadd.f32 %v1118_v40, %v380_v28  ;;  %v1796_v42 = vadd.f32 %v1204_v41, %v388_v29  ;;  %v1120_v43 = vpop.f32.mrb[7].mxu0  ;;  %v1206_v18 = vpop.f32.mrb[7].mxu1  ;;  %v1209_v16 = vmax.f32 %v1790_v34, 0.0  ;;  %v1211_v46 = vmax.f32 %v1794_v35, 0.0 }
 0x235   :  { %v1793_v44 = vadd.f32 %v1120_v43, %v384_v30  ;;  %v1797_v45 = vadd.f32 %v1206_v18, %v392_v31  ;;  %v1210_v47 = vmax.f32 %v1791_v38, 0.0  ;;  %v1212_v48 = vmax.f32 %v1795_v39, 0.0 }
 0x236   :  { %v1213_v13 = vmax.f32 %v1792_v14, 0.0  ;;  %v1215_v20 = vmax.f32 %v1796_v42, 0.0 }
 0x237   :  { %v1214_v49 = vmax.f32 %v1793_v44, 0.0  ;;  %v1216_v50 = vmax.f32 %v1797_v45, 0.0 }
 0x238   :  { %v1217_v51 = vpack.c.bf16 %v1213_v13, %v1209_v16  ;;  %v1219_v52 = vpack.c.bf16 %v1215_v20, %v1211_v46 }
 0x239   :  { %v1218_v54 = vpack.c.bf16 %v1214_v49, %v1210_v47  ;;  %v1220_v55 = vpack.c.bf16 %v1216_v50, %v1212_v48 }
 0x23b   :  { %1516 = vmatprep.mubr.bf16.mxu0 %v1218_v54  ;;  %1557 = vmatprep.mubr.bf16.mxu1 %v1220_v55 }
 0x23c   :  { %1517 = vmatmul.mubr.bf16.vlgmr.msra.gmra.mrb[8].mxu0 %v1217_v51  ;;  %1558 = vmatmul.mubr.bf16.vlgmr.msra.gmra.mrb[8].mxu1 %v1219_v52 }
 0x30f   :  { %v1762_v56 = vpop.f32.mrb[8].mxu0  ;;  %v1784_v57 = vpop.f32.mrb[8].mxu1 }
 0x310   :  { %v1763_v59 = vpop.f32.mrb[9].mxu0  ;;  %v1785_v60 = vpop.f32.mrb[9].mxu1 }
 0x311   :  { %v1764_v61 = vadd.f32 %v1763_v59, %v1762_v56  ;;  %v1786_v62 = vadd.f32 %v1785_v60, %v1784_v57  ;;  %v1765_v63 = vpop.f32.mrb[10].mxu0  ;;  %v1787_v0 = vpop.f32.mrb[10].mxu1 }
 0x312   :  { %v1766_v1 = vpop.f32.mrb[11].mxu0  ;;  %v1788_v2 = vpop.f32.mrb[11].mxu1 }
 0x313   :  { %v1519_v3 = vadd.f32 %v1764_v61, %v1713_v58  ;;  %v1767_v4 = vadd.f32 %v1766_v1, %v1765_v63  ;;  %v1789_v5 = vadd.f32 %v1788_v2, %v1787_v0 }
 0x315   :  { %v1560_v53 = vadd.f32 %v1786_v62, %v1519_v3  ;;  %v1522_v6 = vadd.f32 %v1767_v4, %v1713_v58 }
 0x317   :  { %1566 = vst [vmem:[%s2265_s7] sm:$0xff] %v1560_v53  ;;  %v1563_v7 = vadd.f32 %v1789_v5, %v1522_v6 }
 0x319   :  { %1567 = vst [vmem:[%s2265_s7 + $0x8] sm:$0xff] %v1563_v7 }
 0x31a   :  { %1572 = vsyncpa [#allocation3], 1 }
 0x31b   :  { %1573 = vsyncpa [#allocation5], 1 }

</bundles_post_ra>
